<compile_context>
chip_gen: v7x
topology: tpu7x:2x2x1
jax: 0.10.0
libtpu: 0.0.40
codegen_flags: <defaults>
</compile_context>

<pallas_src>
import functools

import numpy as np
import jax
import jax.numpy as jnp
from jax.experimental import pallas as pl
from jax.experimental.pallas import tpu as pltpu  # noqa: F401  (TPU tuning hooks)

LANE = 128  # lane width of one vreg / lane-dense output granularity


def _round_up(x, m):
    return ((x + m - 1) // m) * m


def _as_1d_f32(x):
    """Accept numpy arrays, jax arrays or pandas-like objects (.values)."""
    if hasattr(x, "values"):
        x = x.values
    return np.asarray(x, dtype=np.float32).reshape(-1)


# --------------------------------------------------------------------------
# Kernel: fused per-row mean/std + feature placement.
# --------------------------------------------------------------------------
def _stats_kernel(x_ref, inv_n_ref, n_ref, coef_ref, out_ref, *, needs_mask):
    """x_ref:    (S, N_pad) f32 — zero-padded rows (bid rows, ask rows, series rows)
    inv_n_ref: (S, 1) f32     — 1 / true_count per row
    n_ref:     (S, 1) i32     — true_count per row (only used when needs_mask)
    coef_ref:  (2, S, L) f32  — static placement coefficients (mean, std)
    out_ref:   (1, L) f32     — lane-dense feature row in final dict order
    """
    x = x_ref[...]                                                # (S, N_pad)
    inv_n = inv_n_ref[...]                                        # (S, 1)

    # Row means: zero padding does not perturb the sum; divide by true count.
    mean = jnp.sum(x, axis=1, keepdims=True) * inv_n              # (S, 1)

    # Two-pass population variance (ddof=0). Mask padded lanes so the
    # (0 - mean) padding residuals do not enter the sum of squares.
    d = x - mean
    if needs_mask:
        lane = jax.lax.broadcasted_iota(jnp.int32, x.shape, 1)
        d = jnp.where(lane < n_ref[...], d, 0.0)
    std = jnp.sqrt(jnp.sum(d * d, axis=1, keepdims=True) * inv_n)  # (S, 1)

    # Place features directly at their final lane positions.  The coefficient
    # matrices encode the dict-iteration order and the algebraic identities
    #   mean(spread) = mean(ask) - mean(bid),  mean(mid) = (mean(ask)+mean(bid))/2.
    placed = mean * coef_ref[0] + std * coef_ref[1]               # (S, L)
    out_ref[...] = jnp.sum(placed, axis=0, keepdims=True)         # (1, L)


# --------------------------------------------------------------------------
# Pipeline builder: parse the dict structure once, compile one jitted pipeline.
# --------------------------------------------------------------------------
def make_preprocessor(example_state):
    kinds, ns = [], []
    for _, sec in example_state.items():
        if isinstance(sec, dict):
            kinds.append("ba")
            ns.append(_as_1d_f32(sec["bid"]).shape[0])
        else:
            kinds.append("ser")
            ns.append(_as_1d_f32(sec).shape[0])

    s_ba = sum(1 for k in kinds if k == "ba")
    s_ser = len(kinds) - s_ba
    s_total = 2 * s_ba + s_ser
    n_feat = 6 * s_ba + 2 * s_ser

    if s_total == 0:
        def _empty(_state):
            return jnp.zeros((0,), jnp.float32)
        return _empty

    n_pad = _round_up(max(ns), LANE)
    needs_mask = any(n != n_pad for n in ns)
    out_lanes = max(LANE, _round_up(n_feat, LANE))

    # Static placement coefficients + per-row true counts + packing plan.
    coef_mean = np.zeros((s_total, out_lanes), np.float32)
    coef_std = np.zeros((s_total, out_lanes), np.float32)
    row_counts = np.zeros((s_total,), np.float64)
    plan = []  # (kind, row indices, true length) in dict-iteration order
    pos, bi, si = 0, 0, 0
    for kind, n in zip(kinds, ns):
        if kind == "ba":
            rb, ra = bi, s_ba + bi
            bi += 1
            coef_mean[rb, pos + 0] = 1.0        # mean(bid)
            coef_mean[ra, pos + 1] = 1.0        # mean(ask)
            coef_mean[ra, pos + 2] = 1.0        # mean(spread) = mean(ask)-mean(bid)
            coef_mean[rb, pos + 2] = -1.0
            coef_mean[ra, pos + 3] = 0.5        # mean(mid) = (mean(ask)+mean(bid))/2
            coef_mean[rb, pos + 3] = 0.5
            coef_std[rb, pos + 4] = 1.0         # std(bid)  (population, ddof=0)
            coef_std[ra, pos + 5] = 1.0         # std(ask)
            row_counts[rb] = n
            row_counts[ra] = n
            plan.append(("ba", (rb, ra), n))
            pos += 6
        else:
            r = 2 * s_ba + si
            si += 1
            coef_mean[r, pos + 0] = 1.0         # mean(series)
            coef_std[r, pos + 1] = 1.0          # std(series)
            row_counts[r] = n
            plan.append(("ser", (r,), n))
            pos += 2

    # Device-resident constants: transferred once, reused on every call.
    coef = jnp.asarray(np.stack([coef_mean, coef_std], axis=0))
    inv_n = jnp.asarray((1.0 / row_counts).reshape(s_total, 1).astype(np.float32))
    n_cnt = jnp.asarray(row_counts.reshape(s_total, 1).astype(np.int32))

    kernel = functools.partial(_stats_kernel, needs_mask=needs_mask)

    @jax.jit
    def device_fn(x):
        out = pl.pallas_call(
            kernel,
            out_shape=jax.ShapeDtypeStruct((1, out_lanes), jnp.float32),
            in_specs=[
                pl.BlockSpec((s_total, n_pad), lambda: (0, 0)),
                pl.BlockSpec((s_total, 1), lambda: (0, 0)),
                pl.BlockSpec((s_total, 1), lambda: (0, 0)),
                pl.BlockSpec((2, s_total, out_lanes), lambda: (0, 0, 0)),
            ],
            out_specs=pl.BlockSpec((1, out_lanes), lambda: (0, 0)),
        )(x, inv_n, n_cnt, coef)
        return out[0, :n_feat]  # features already in final dict order

    def pack(state):
        """Host glue: one zero-padded buffer, one H2D transfer per call."""
        buf = np.zeros((s_total, n_pad), np.float32)
        for (kind, rows, n), (_, sec) in zip(plan, state.items()):
            if kind == "ba":
                rb, ra = rows
                buf[rb, :n] = _as_1d_f32(sec["bid"])
                buf[ra, :n] = _as_1d_f32(sec["ask"])
            else:
                (r,) = rows
                buf[r, :n] = _as_1d_f32(sec)
        return jnp.asarray(buf)

    def preprocess(state):
        return device_fn(pack(state))

    preprocess.device_fn = device_fn  # callers with device-resident packed
    preprocess.pack = pack            # inputs can skip the host pack entirely
    return preprocess


# --------------------------------------------------------------------------
# Convenience entry point with a per-structure pipeline cache.
# --------------------------------------------------------------------------
_PIPELINES = {}


def _signature(state):
    sig = []
    for name, sec in state.items():
        if isinstance(sec, dict):
            sig.append((name, "ba", _as_1d_f32(sec["bid"]).shape[0]))
        else:
            sig.append((name, "ser", _as_1d_f32(sec).shape[0]))
    return tuple(sig)


def preprocess_state_pallas(state):
    sig = _signature(state)
    fn = _PIPELINES.get(sig)
    if fn is None:
        fn = make_preprocessor(state)
        _PIPELINES[sig] = fn
    return fn(state)


# --------------------------------------------------------------------------
# Pure-numpy reference of the torch code path (population std, ddof=0 — the
# original module uses np.mean / np.std before building the torch tensor).
# --------------------------------------------------------------------------
def preprocess_state_ref(state):
    features = []
    for _, section in state.items():
        if isinstance(section, dict):
            bid = _as_1d_f32(section["bid"])
            ask = _as_1d_f32(section["ask"])
            spread = ask - bid
            mid = (ask + bid) / 2
            features.extend(
                [np.mean(bid), np.mean(ask), np.mean(spread),
                 np.mean(mid), np.std(bid), np.std(ask)]
            )
        else:
            x = _as_1d_f32(section)
            features.extend([np.mean(x), np.std(x)])
    return np.asarray(features, dtype=np.float32)


if __name__ == "__main__":
    key = jax.random.PRNGKey(0)
    k1, k2, k3, k4, k5 = jax.random.split(key, 5)

    N = 256     # bonds / swaps length (lane-aligned)
    N_FX = 200  # fx length — deliberately NOT a lane multiple (exercises mask path)

    state = {
        "bonds": {
            "bid": np.asarray(100.0 + jax.random.normal(k1, (N,)), np.float32),
            "ask": np.asarray(100.2 + jax.random.normal(k2, (N,)), np.float32),
        },
        "swaps": {
            "bid": np.asarray(50.0 + 0.5 * jax.random.normal(k3, (N,)), np.float32),
            "ask": np.asarray(50.1 + 0.5 * jax.random.normal(k4, (N,)), np.float32),
        },
        "fx": np.asarray(1.1 + 0.01 * jax.random.normal(k5, (N_FX,)), np.float32),
    }

    out = jax.block_until_ready(preprocess_state_pallas(state))
    # Second call reuses the cached compiled pipeline (no retrace / recompile).
    out2 = jax.block_until_ready(preprocess_state_pallas(state))

    ref = preprocess_state_ref(state)
    np.testing.assert_allclose(np.asarray(out), ref, rtol=1e-4, atol=5e-4)
    np.testing.assert_allclose(np.asarray(out2), ref, rtol=1e-4, atol=5e-4)

    print("KERNEL_OK")
</pallas_src>

<mosaic_0001>
module attributes {stable_mosaic.version = 11 : i64} {
  func.func @_stats_kernel(%arg0: memref<5x256xf32, #tpu.memory_space<vmem>>, %arg1: memref<5x1xf32, #tpu.memory_space<vmem>>, %arg2: memref<5x1xi32, #tpu.memory_space<vmem>>, %arg3: memref<2x5x128xf32, #tpu.memory_space<vmem>>, %arg4: memref<1x128xf32, #tpu.memory_space<vmem>>) attributes {dimension_semantics = [], scalar_prefetch = 0 : i64, scratch_operands = 0 : i64, tpu.core_type = #tpu.core_type<tc>} {
    %c0 = arith.constant 0 : index
    %c0_0 = arith.constant 0 : index
    %0 = vector.load %arg0[%c0, %c0_0] : memref<5x256xf32, #tpu.memory_space<vmem>>, vector<5x256xf32>
    %c0_1 = arith.constant 0 : index
    %c0_2 = arith.constant 0 : index
    %1 = vector.load %arg1[%c0_1, %c0_2] : memref<5x1xf32, #tpu.memory_space<vmem>>, vector<5x1xf32>
    %cst = arith.constant dense<0.000000e+00> : vector<5xf32>
    %2 = vector.multi_reduction <add>, %0, %cst [1] : vector<5x256xf32> to vector<5xf32>
    %3 = vector.shape_cast %2 : vector<5xf32> to vector<5x1xf32>
    %4 = arith.mulf %3, %1 : vector<5x1xf32>
    %5 = vector.broadcast %4 : vector<5x1xf32> to vector<5x256xf32>
    %6 = arith.subf %0, %5 : vector<5x256xf32>
    %7 = tpu.iota {dimensions = array<i32: 1>} : vector<5x256xi32>
    %c0_3 = arith.constant 0 : index
    %c0_4 = arith.constant 0 : index
    %8 = vector.load %arg2[%c0_3, %c0_4] : memref<5x1xi32, #tpu.memory_space<vmem>>, vector<5x1xi32>
    %9 = vector.broadcast %8 : vector<5x1xi32> to vector<5x256xi32>
    %10 = arith.cmpi slt, %7, %9 : vector<5x256xi32>
    %cst_5 = arith.constant 0.000000e+00 : f32
    %11 = vector.broadcast %cst_5 : f32 to vector<5x256xf32>
    %12 = arith.select %10, %6, %11 : vector<5x256xi1>, vector<5x256xf32>
    %13 = arith.mulf %12, %12 : vector<5x256xf32>
    %cst_6 = arith.constant dense<0.000000e+00> : vector<5xf32>
    %14 = vector.multi_reduction <add>, %13, %cst_6 [1] : vector<5x256xf32> to vector<5xf32>
    %15 = vector.shape_cast %14 : vector<5xf32> to vector<5x1xf32>
    %16 = arith.mulf %15, %1 : vector<5x1xf32>
    %17 = math.sqrt %16 : vector<5x1xf32>
    %c0_7 = arith.constant 0 : index
    %c0_8 = arith.constant 0 : index
    %c0_9 = arith.constant 0 : index
    %18 = vector.load %arg3[%c0_7, %c0_8, %c0_9] : memref<2x5x128xf32, #tpu.memory_space<vmem>>, vector<1x5x128xf32>
    %19 = vector.shape_cast %18 : vector<1x5x128xf32> to vector<5x128xf32>
    %20 = vector.broadcast %4 : vector<5x1xf32> to vector<5x128xf32>
    %21 = arith.mulf %20, %19 : vector<5x128xf32>
    %c1 = arith.constant 1 : index
    %c0_10 = arith.constant 0 : index
    %c0_11 = arith.constant 0 : index
    %22 = vector.load %arg3[%c1, %c0_10, %c0_11] : memref<2x5x128xf32, #tpu.memory_space<vmem>>, vector<1x5x128xf32>
    %23 = vector.shape_cast %22 : vector<1x5x128xf32> to vector<5x128xf32>
    %24 = vector.broadcast %17 : vector<5x1xf32> to vector<5x128xf32>
    %25 = arith.mulf %24, %23 : vector<5x128xf32>
    %26 = arith.addf %21, %25 : vector<5x128xf32>
    %cst_12 = arith.constant dense<0.000000e+00> : vector<128xf32>
    %27 = vector.multi_reduction <add>, %26, %cst_12 [0] : vector<5x128xf32> to vector<128xf32>
    %28 = vector.shape_cast %27 : vector<128xf32> to vector<1x128xf32>
    %c0_13 = arith.constant 0 : index
    %c0_14 = arith.constant 0 : index
    %29 = vector.load %arg4[%c0_13, %c0_14] : memref<1x128xf32, #tpu.memory_space<vmem>>, vector<1x128xf32>
    tpu.vector_store %arg4[%c0_13, %c0_14], %28 {strides = array<i32>} : memref<1x128xf32, #tpu.memory_space<vmem>>, vector<1x128xf32>,
    return
  }
}

</mosaic_0001>

<bundles_post_ra>
// kernel: device_fn.1
= control target key start
LH: loop header
LB: loop body
LE: loop exit
PB: predicated region body
PF: predicated region fallthrough
CT: control target
= control target key end

     0   :  { %9 = vsyncpa [#allocation3], 0  ;;  %s335_s0 = inlined_call_operand.hbm [shape: f32[5,256], index: 0, kind: input, shape index: {}]   ;;  %s336_s1 = inlined_call_operand.hbm [shape: f32[5,1], index: 1, kind: input, shape index: {}]   ;;  %s337_s2 = inlined_call_operand.hbm [shape: s32[5,1], index: 2, kind: input, shape index: {}]   ;;  %s338_s3 = inlined_call_operand.hbm [shape: f32[2,5,128], index: 3, kind: input, shape index: {}]   ;;  %s339_s4 = inlined_call_operand.vmem [shape: f32[1,128], index: 4, kind: output, shape index: {}]  }
   0x1   :  { %10 = vsyncpa [#allocation5], 0 }
   0x2   :  { %11 = vsyncpa [#allocation8], 0  ;;  %s240_s15 = smov [#allocation4]   ;;  %s241_s17 = smov [#allocation2]  }
   0x3   :  { %s28_s16 = sshll.u32 %s240_s15, 4  ;;  %s18_s18 = sshll.u32 %s241_s17, 4  ;;  %s29_s16 = int_to_ptr.vmem [resolvable:$true] %s28_s16  ;;  %s19_s18 = int_to_ptr.vmem [resolvable:$true] %s18_s18 }
   0x4   :  { %s146_s21 = scalar_lea.hbm %s336_s1, 128 }
   0x5   :  { %p147_p0 = scmp.ne.s32.totalorder %s336_s1, %s146_s21  ;;  %p150_p1 = scmp.lt.u32.totalorder %s146_s21, %s336_s1 }
   0x7   :  { %p152_p2 = pnand %p150_p1, %p147_p0 }
   0x9   :  { %155 = shalt.err (!%p152_p2)
}
   0xa   :  { %s156_s26 = scalar_lea.vmem %s29_s16, 128  ;;  %p161_p4 = scmp.lt.s32.totalorder %s29_s16, %s29_s16 }
   0xb   :  { %p157_p3 = scmp.ne.s32.totalorder %s29_s16, %s156_s26  ;;  %p162_p5 = scmp.lt.s32.totalorder %s156_s26, %s156_s26 }
   0xd   :  { %p163_p6 = por %p162_p5, %p161_p4 }
   0xf   :  { %p164_p7 = pnand %p163_p6, %p157_p3 }
  0x11   :  { %167 = shalt.err (!%p164_p7)
}
  0x12   :  { %31 = dma.hbm_to_vmem [thread:$0]  %s336_s1, 128, %s29_s16, [#allocation5]  }
  0x13   :  { %s168_s5 = scalar_lea.hbm %s335_s0, 256 }
  0x14   :  { %p169_p8 = scmp.ne.s32.totalorder %s335_s0, %s168_s5  ;;  %p172_p9 = scmp.lt.u32.totalorder %s168_s5, %s335_s0 }
  0x16   :  { %p174_p10 = pnand %p172_p9, %p169_p8 }
  0x18   :  { %177 = shalt.err (!%p174_p10)
}
  0x19   :  { %s178_s10 = scalar_lea.vmem %s19_s18, 256  ;;  %p183_p12 = scmp.lt.s32.totalorder %s19_s18, %s19_s18 }
  0x1a   :  { %p179_p11 = scmp.ne.s32.totalorder %s19_s18, %s178_s10  ;;  %p184_p13 = scmp.lt.s32.totalorder %s178_s10, %s178_s10 }
  0x1c   :  { %p185_p0 = por %p184_p13, %p183_p12 }
  0x1e   :  { %p186_p1 = pnand %p185_p0, %p179_p11 }
  0x20   :  { %189 = shalt.err (!%p186_p1)
}
  0x21   :  { %21 = dma.hbm_to_vmem [thread:$0]  %s335_s0, 256, %s19_s18, [#allocation3]  }
  0x22   :  { %s242_s12 = smov [#allocation6]   ;;  %s243_s14 = smov [#allocation7]  }
  0x23   :  { %s38_s13 = sshll.u32 %s242_s12, 4  ;;  %s47_s15 = sshll.u32 %s243_s14, 4  ;;  %s39_s13 = int_to_ptr.vmem [resolvable:$true] %s38_s13  ;;  %s296_s15 = int_to_ptr.vmem [resolvable:$true] %s47_s15 }
  0x24   :  { %s190_s19 = scalar_lea.hbm %s337_s2, 128 }
  0x25   :  { %p191_p2 = scmp.ne.s32.totalorder %s337_s2, %s190_s19  ;;  %p194_p3 = scmp.lt.u32.totalorder %s190_s19, %s337_s2 }
  0x27   :  { %p196_p4 = pnand %p194_p3, %p191_p2 }
  0x29   :  { %199 = shalt.err (!%p196_p4)
}
  0x2a   :  { %s200_s0 = scalar_lea.vmem %s39_s13, 128  ;;  %p205_p6 = scmp.lt.s32.totalorder %s39_s13, %s39_s13 }
  0x2b   :  { %p201_p5 = scmp.ne.s32.totalorder %s39_s13, %s200_s0  ;;  %p206_p7 = scmp.lt.s32.totalorder %s200_s0, %s200_s0 }
  0x2d   :  { %p207_p8 = por %p206_p7, %p205_p6 }
  0x2f   :  { %p208_p9 = pnand %p207_p8, %p201_p5 }
  0x31   :  { %211 = shalt.err (!%p208_p9)
}
  0x32   :  { %41 = dma.hbm_to_vmem [thread:$0]  %s337_s2, 128, %s39_s13, [#allocation5]  }
  0x33   :  { %s212_s27 = scalar_lea.hbm %s338_s3, 256 }
  0x34   :  { %p213_p10 = scmp.ne.s32.totalorder %s338_s3, %s212_s27  ;;  %p216_p11 = scmp.lt.u32.totalorder %s212_s27, %s338_s3 }
  0x36   :  { %p218_p12 = pnand %p216_p11, %p213_p10 }
  0x38   :  { %221 = shalt.err (!%p218_p12)
}
  0x39   :  { %s222_s6 = scalar_lea.vmem %s296_s15, 256  ;;  %p227_p0 = scmp.lt.s32.totalorder %s296_s15, %s296_s15 }
  0x3a   :  { %p223_p13 = scmp.ne.s32.totalorder %s296_s15, %s222_s6  ;;  %p228_p1 = scmp.lt.s32.totalorder %s222_s6, %s222_s6 }
  0x3c   :  { %p229_p2 = por %p228_p1, %p227_p0 }
  0x3e   :  { %p230_p3 = pnand %p229_p2, %p223_p13 }
  0x40   :  { %233 = shalt.err (!%p230_p3)
}
  0x41   :  { %s244_s2 = smov 128   ;;  %s245_s7 = smov 8  }
  0x42   :  { %53 = dma.hbm_to_vmem [thread:$0]  %s338_s3, 256, %s296_s15, [#allocation8], %s244_s2, %s244_s2, %s245_s7  }
  0x43   :  { %234 = dma.done.wait [#allocation3], 256  }
  0x44   :  { %235 = vsyncadd [#allocation3], 4294967040 }
  0x45   :  { %236 = dma.done.wait [#allocation5], 256  }
  0x46   :  { %237 = vsyncadd [#allocation5], 4294967040 }
  0x47   :  { %238 = dma.done.wait [#allocation8], 256  }
  0x48   :  { %239 = vsyncadd [#allocation8], 4294967040  ;;  %vm69_vm0 = vcmask 1044480   ;;  %v66_v0 = vld [vmem:[#allocation2] sm:$0x1f]  ;;  %v246_v5 = vmov 0   ;;  %v83_v10 = vlaneseq }
  0x49   :  { %v67_v1 = vld [vmem:[#allocation2 + $0x8] sm:$0x1f]  ;;  %v70_v2 = vsel %vm69_vm0, %v66_v0, 0.0  ;;  %142 = vset.pattern.permute.xlu0 %v246_v5  ;;  %143 = vset.pattern.permute.xlu1 %v246_v5  ;;  %v86_v6 = vld [vmem:[#allocation6] sm:$0x1f] }
  0x4a   :  { %v71_v3 = vsel %vm69_vm0, %v67_v1, 0.0  ;;  %88 = vperm.xlu1 %143, %v86_v6   ;;  %v68_v7 = vld [vmem:[#allocation4] sm:$0x1f]  ;;  %v84_v11 = vand.u32 127, %v83_v10  ;;  %v109_v31 = vld [vmem:[#allocation7] sm:$0x1f] }
  0x4b   :  { %v72_v4 = vadd.f32 %v71_v3, %v70_v2  ;;  %v112_v32 = vld [vmem:[#allocation7 + $0x8] sm:$0x1f] }
  0x4c   :  { %v85_v12 = vadd.s32 128, %v84_v11 }
  0x4d   :  { %73 = vadd.xlane.f32.xlu0 %v72_v4 }
  0xc9   :  { %v89_v13 = vpop.permute.xlu1 %88 }
  0xca   :  { %vm90_vm1 = vcmp.lt.s32.totalorder %v84_v11, %v89_v13  ;;  %vm91_vm2 = vcmp.lt.s32.totalorder %v85_v12, %v89_v13 }
  0xda   :  { %v74_v8 = vpop.xlane.xlu0 %73 }
  0xdb   :  { %v75_v9 = vmul.f32 %v74_v8, %v68_v7 }
  0xdd   :  { %78 = vperm.xlu0 %142, %v75_v9  }
 0x15c   :  { %v79_v14 = vpop.permute.xlu0 %78 }
 0x15d   :  { %v81_v15 = vsub.f32 %v66_v0, %v79_v14  ;;  %v82_v16 = vsub.f32 %v67_v1, %v79_v14  ;;  %v110_v34 = vmul.f32 %v109_v31, %v79_v14 }
 0x15f   :  { %v92_v17 = vsel %vm90_vm1, %v81_v15, 0.0  ;;  %v93_v18 = vsel %vm91_vm2, %v82_v16, 0.0 }
 0x160   :  { %v94_v19 = vmul.f32 %v92_v17, %v92_v17  ;;  %v95_v20 = vmul.f32 %v93_v18, %v93_v18 }
 0x162   :  { %v96_v21 = vsel %vm69_vm0, %v94_v19, 0.0  ;;  %v97_v22 = vsel %vm69_vm0, %v95_v20, 0.0 }
 0x163   :  { %v98_v23 = vadd.f32 %v97_v22, %v96_v21 }
 0x165   :  { %99 = vadd.xlane.f32.xlu1 %v98_v23 }
 0x1f2   :  { %v100_v24 = vpop.xlane.xlu1 %99 }
 0x1f3   :  { %v101_v25 = vmul.f32 %v100_v24, %v68_v7 }
 0x1f5   :  { %144 = vrsqrt.f32 %v101_v25  ;;  %vm104_vm3 = vcmp.eq.f32.partialorder %v101_v25, inf  ;;  %v107_v28 = vand.u32 2147483648, %v101_v25  ;;  %vm106_vm4 = vcmp.eq.f32.partialorder %v101_v25, 0.0 }
 0x1ff   :  { %v145_v26 = vpop.eup %144 }
 0x200   :  { %v103_v27 = vmul.f32 %v145_v26, %v101_v25 }
 0x202   :  { %v105_v29 = vsel %vm104_vm3, %v101_v25, %v103_v27 }
 0x203   :  { %v108_v30 = vsel %vm106_vm4, %v107_v28, %v105_v29 }
 0x204   :  { %115 = vperm.xlu1 %143, %v108_v30  }
 0x283   :  { %v116_v33 = vpop.permute.xlu1 %115 }
 0x284   :  { %v118_v35 = vmul.f32 %v116_v33, %v112_v32 }
 0x286   :  { %v119_v36 = vadd.f32 %v118_v35, %v110_v34 }
 0x288   :  { %v120_v37 = vsel %vm69_vm0, %v119_v36, 0.0 }
 0x289   :  { %v121_v38 = vrot.slane %v120_v37, 4 }
 0x28b   :  { %v122_v39 = vadd.f32 %v121_v38, %v120_v37 }
 0x28d   :  { %v123_v40 = vrot.slane %v122_v39, 2 }
 0x28f   :  { %v124_v41 = vadd.f32 %v123_v40, %v122_v39 }
 0x291   :  { %v125_v42 = vrot.slane %v124_v41, 1 }
 0x293   :  { %v126_v43 = vadd.f32 %v125_v42, %v124_v41 }
 0x295   :  { %127 = vst [vmem:[%s339_s4] sm:$0x1] %v126_v43 }
 0x296   :  { %132 = vsyncpa [#allocation3], 1 }
 0x297   :  { %133 = vsyncpa [#allocation5], 1 }
 0x298   :  { %134 = vsyncpa [#allocation8], 1 }

</bundles_post_ra>
